<compile_context>
chip_gen: v7x
topology: tpu7x:2x2x1
jax: 0.10.0
libtpu: 0.0.40
codegen_flags: <defaults>
</compile_context>

<pallas_src>
import jax
import jax.numpy as jnp
from jax.experimental import pallas as pl
from jax.experimental.pallas import tpu as pltpu


# ---------------------------------------------------------------------------
# Prologue: proj = noise_embed @ W + b for all batch rows at once (one GEMM).
# ---------------------------------------------------------------------------
def _noise_proj_kernel(ne_ref, w_ref, b_ref, proj_ref):
    proj_ref[...] = (
        jnp.dot(ne_ref[...], w_ref[...], preferred_element_type=jnp.float32)
        + b_ref[...].astype(jnp.float32)
    )


def _noise_projection(noise_embed, weight, bias):
    B = noise_embed.shape[0]
    D_out = weight.shape[1]
    # Tiny whole-array kernel (no grid): everything fits trivially in VMEM.
    return pl.pallas_call(
        _noise_proj_kernel,
        out_shape=jax.ShapeDtypeStruct((B, D_out), jnp.float32),
    )(noise_embed, weight, bias.reshape(1, D_out))


# ---------------------------------------------------------------------------
# Main kernels: broadcast-FMA over (C, hw_tile) blocks, H*W on the lane axis.
# ---------------------------------------------------------------------------
def _affine_kernel(gamma_ref, beta_ref, x_ref, out_ref):
    # gamma_ref/beta_ref: (1, C, 1) f32 ; x_ref/out_ref: (1, C, T)
    x = x_ref[0].astype(jnp.float32)                              # (C, T)
    out_ref[0] = ((1.0 + gamma_ref[0]) * x + beta_ref[0]).astype(out_ref.dtype)


def _shift_kernel(beta_ref, x_ref, out_ref):
    x = x_ref[0].astype(jnp.float32)                              # (C, T)
    out_ref[0] = (x + beta_ref[0]).astype(out_ref.dtype)


def _pick_hw_tile(hw, c, itemsize, vmem_budget_bytes=8 * 1024 * 1024):
    """Largest spatial (lane) tile so ~4x (double-buffered in + out) blocks fit
    the budget; tile is a multiple of 128 lanes and divides hw, else full hw."""
    max_t = max(128, vmem_budget_bytes // (4 * c * itemsize))
    if hw <= max_t:
        return hw
    t = (max_t // 128) * 128
    while t >= 128:
        if hw % t == 0:
            return t
        t -= 128
    return hw  # no aligned divisor -> one block per batch element


def feature_wise_affine(x_nchw, noise_embed, weight, bias,
                        use_affine_level=False, hw_tile=None):
    """x_nchw: (B, C, H, W); noise_embed: (B, D_in);
    weight: (D_in, C*(1+affine)); bias: (C*(1+affine),)."""
    B, C, H, W = x_nchw.shape
    HW = H * W
    D_out = weight.shape[1]
    assert D_out == C * (1 + int(use_affine_level))

    # Hoisted projection: one batched GEMM for all B rows, gamma/beta in f32.
    proj = _noise_projection(noise_embed, weight, bias)           # (B, D_out) f32

    # Native layout: NCHW -> (B, C, HW) is a free reshape (no transpose).
    x_flat = x_nchw.reshape(B, C, HW)

    T = hw_tile if hw_tile is not None else _pick_hw_tile(
        HW, C, x_nchw.dtype.itemsize)
    assert HW % T == 0
    n_spatial = HW // T

    x_spec = pl.BlockSpec((1, C, T), lambda b, s: (b, 0, s))
    gb_spec = pl.BlockSpec((1, C, 1), lambda b, s: (b, 0, 0))

    if use_affine_level:
        gamma = proj[:, :C].reshape(B, C, 1)
        beta = proj[:, C:].reshape(B, C, 1)
        kernel = _affine_kernel
        inputs = (gamma, beta, x_flat)
        in_specs = [gb_spec, gb_spec, x_spec]
    else:
        beta = proj.reshape(B, C, 1)
        kernel = _shift_kernel
        inputs = (beta, x_flat)
        in_specs = [gb_spec, x_spec]

    out_flat = pl.pallas_call(
        kernel,
        out_shape=jax.ShapeDtypeStruct((B, C, HW), x_nchw.dtype),
        grid_spec=pltpu.PrefetchScalarGridSpec(
            num_scalar_prefetch=0,
            grid=(B, n_spatial),
            in_specs=in_specs,
            out_specs=x_spec,
        ),
        compiler_params=pltpu.CompilerParams(
            dimension_semantics=("parallel", "parallel"),
            vmem_limit_bytes=32 * 1024 * 1024,
        ),
    )(*inputs)

    return out_flat.reshape(B, C, H, W)


def _reference(x, noise_embed, weight, bias, use_affine_level):
    B, C, H, W = x.shape
    proj = noise_embed @ weight + bias                            # (B, D_out)
    if use_affine_level:
        proj = proj.reshape(B, 2 * C, 1, 1)
        gamma, beta = proj[:, :C], proj[:, C:]
        return (1.0 + gamma) * x + beta
    return x + proj.reshape(B, C, 1, 1)


if __name__ == "__main__":
    key = jax.random.PRNGKey(0)
    k_x, k_ne, k_w0, k_b0, k_w1, k_b1 = jax.random.split(key, 6)

    B, C, H, W = 2, 4, 16, 16      # out_channels = 4
    D_in = 32                      # noise embedding dim

    x = jax.random.normal(k_x, (B, C, H, W), dtype=jnp.float32)
    noise_embed = jax.random.normal(k_ne, (B, D_in), dtype=jnp.float32)

    ok = True
    for use_affine_level, kw, kb in ((False, k_w0, k_b0), (True, k_w1, k_b1)):
        D_out = C * (1 + int(use_affine_level))
        lim = 1.0 / (D_in ** 0.5)   # PyTorch-Linear-like init scale
        weight = jax.random.uniform(kw, (D_in, D_out), jnp.float32, -lim, lim)
        bias = jax.random.uniform(kb, (D_out,), jnp.float32, -lim, lim)

        ref = _reference(x, noise_embed, weight, bias, use_affine_level)

        # Auto tile (single spatial block per batch element).
        out = feature_wise_affine(x, noise_embed, weight, bias,
                                  use_affine_level=use_affine_level)
        out = jax.block_until_ready(out)
        ok = ok and bool(jnp.allclose(out, ref, atol=1e-5, rtol=1e-5))

        # Explicit spatial tiling (HW=256 -> two 128-lane tiles) to exercise
        # the 2-D grid path.
        out_t = feature_wise_affine(x, noise_embed, weight, bias,
                                    use_affine_level=use_affine_level,
                                    hw_tile=128)
        out_t = jax.block_until_ready(out_t)
        ok = ok and bool(jnp.allclose(out_t, ref, atol=1e-5, rtol=1e-5))

    if ok:
        print("KERNEL_OK")
</pallas_src>

<mosaic_0001>
module attributes {stable_mosaic.version = 11 : i64} {
  func.func @_noise_proj_kernel(%arg0: memref<2x32xf32, #tpu.memory_space<vmem>>, %arg1: memref<32x4xf32, #tpu.memory_space<vmem>>, %arg2: memref<1x4xf32, #tpu.memory_space<vmem>>, %arg3: memref<2x4xf32, #tpu.memory_space<vmem>>) attributes {dimension_semantics = [], scalar_prefetch = 0 : i64, scratch_operands = 0 : i64, tpu.core_type = #tpu.core_type<tc>} {
    %c0 = arith.constant 0 : index
    %c0_0 = arith.constant 0 : index
    %0 = vector.load %arg0[%c0, %c0_0] : memref<2x32xf32, #tpu.memory_space<vmem>>, vector<2x32xf32>
    %c0_1 = arith.constant 0 : index
    %c0_2 = arith.constant 0 : index
    %1 = vector.load %arg1[%c0_1, %c0_2] : memref<32x4xf32, #tpu.memory_space<vmem>>, vector<32x4xf32>
    %cst = arith.constant dense<0.000000e+00> : vector<2x4xf32>
    %2 = tpu.matmul %0, %1, %cst {dimension_numbers = #tpu.dot_dimension_numbers<[1], [0], [0], [1], [0, 0, 1, 1], [], []>} : vector<2x32xf32>, vector<32x4xf32>, vector<2x4xf32> -> vector<2x4xf32>
    %c0_3 = arith.constant 0 : index
    %c0_4 = arith.constant 0 : index
    %3 = vector.load %arg2[%c0_3, %c0_4] : memref<1x4xf32, #tpu.memory_space<vmem>>, vector<1x4xf32>
    %4 = vector.broadcast %3 : vector<1x4xf32> to vector<2x4xf32>
    %5 = arith.addf %2, %4 : vector<2x4xf32>
    %c0_5 = arith.constant 0 : index
    %c0_6 = arith.constant 0 : index
    %6 = vector.load %arg3[%c0_5, %c0_6] : memref<2x4xf32, #tpu.memory_space<vmem>>, vector<2x4xf32>
    tpu.vector_store %arg3[%c0_5, %c0_6], %5 {strides = array<i32>} : memref<2x4xf32, #tpu.memory_space<vmem>>, vector<2x4xf32>,
    return
  }
}

</mosaic_0001>

<bundles_post_ra>
// kernel: tpu_custom_call.1
= control target key start
LH: loop header
LB: loop body
LE: loop exit
PB: predicated region body
PF: predicated region fallthrough
CT: control target
= control target key end

     0   :  { %v169_v3 = vmov 0.0|0.0   ;;  %vm170_vm0 = vmmov 0   ;;  %v171_v6 = vmov 0.0   ;;  %s223_s0 = inlined_call_operand.vmem [shape: f32[2,32], index: 0, kind: input, shape index: {}]   ;;  %s224_s1 = inlined_call_operand.vmem [shape: f32[32,4], index: 1, kind: input, shape index: {}]   ;;  %s225_s2 = inlined_call_operand.vmem [shape: f32[1,4], index: 2, kind: input, shape index: {}]   ;;  %s226_s3 = inlined_call_operand.hbm [shape: f32[2,4], index: 3, kind: output, shape index: {}]  }
   0x1   :  { %v16_v0 = vld [vmem:[%s224_s1] sm:$0xff]  ;;  %v17_v1 = vld [vmem:[%s224_s1 + $0x8] sm:$0xff]  ;;  %v18_v2 = vld [vmem:[%s224_s1 + $0x10] sm:$0xff]  ;;  %135 = vmatprep.subr.bf16.mxu0 %v169_v3  ;;  %132 = vmatprep.mubr.msk.f32.mxu0 %vm170_vm0, %v171_v6 }
   0x2   :  { %v136_v4 = vpack.c.bf16 %v17_v1, %v16_v0  ;;  %v19_v5 = vld [vmem:[%s224_s1 + $0x18] sm:$0xff] }
   0x3   :  { %8 = vsyncpa [#allocation3], 0  ;;  %v139_v7 = vpack.c.bf16 %v19_v5, %v18_v2  ;;  %v15_v8 = vld [vmem:[%s223_s0] sm:$0x3]  ;;  %vm27_vm1 = vcmask 261120   ;;  %s172_s24 = smov [#allocation2]  }
   0x4   :  { %137 = vmatpush3.bf16.msra.mxu0 %v136_v4  ;;  %v117_v9 = vld [vmem:[%s225_s2] ss:$0 sm:$0xff]  ;;  %s109_s1 = sshll.u32 %s172_s24, 4  ;;  %vm101_vm2 = vcmask 25600   ;;  %s110_s1 = int_to_ptr.vmem [resolvable:$true] %s109_s1 }
   0x5   :  { %138 = vmatprep.subr.bf16.mxu0 %v169_v3  ;;  %s145_s25 = scalar_lea.vmem %s110_s1, 32  ;;  %p150_p1 = scmp.lt.s32.totalorder %s110_s1, %s110_s1 }
   0x6   :  { %p146_p0 = scmp.ne.s32.totalorder %s110_s1, %s145_s25  ;;  %p151_p2 = scmp.lt.s32.totalorder %s145_s25, %s145_s25 }
   0x8   :  { %140 = vmatpush3.bf16.msra.mxu0 %v139_v7  ;;  %p152_p3 = por %p151_p2, %p150_p1 }
   0xa   :  { %p153_p4 = pnand %p152_p3, %p146_p0 }
   0xb   :  { %133 = vmatmul.mubr.msk.f32.vlgmr.msra.gmra.mrb[0].mxu0 %vm27_vm1, %v15_v8 }
  0xde   :  { %v97_v10 = vpop.f32.mrb[0].mxu0 }
  0xdf   :  { %v98_v11 = vadd.f32 %v117_v9, %v97_v10  ;;  %v134_v12 = vpop.f32.mrb[1].mxu0 }
  0xe1   :  { %102 = vst.msk [vmem:[#allocation2] sm:$0x3] %vm101_vm2, %v98_v11 }
  0xe2   :  { %156 = shalt.err (!%p153_p4)
}
  0xe3   :  { %s157_s27 = scalar_lea.hbm %s226_s3, 32 }
  0xe4   :  { %p158_p5 = scmp.ne.s32.totalorder %s226_s3, %s157_s27  ;;  %p161_p6 = scmp.lt.u32.totalorder %s157_s27, %s226_s3 }
  0xe6   :  { %p163_p7 = pnand %p161_p6, %p158_p5 }
  0xe8   :  { %166 = shalt.err (!%p163_p7)
}
  0xe9   :  { %112 = dma.vmem_to_hbm [thread:$0]  %s110_s1, 32, %s226_s3, [#allocation3]  }
  0xea   :  { %167 = dma.done.wait [#allocation3], 32  }
  0xeb   :  { %168 = vsyncadd [#allocation3], 4294967264 }
  0xec   :  { %116 = vsyncpa [#allocation3], 1 }

</bundles_post_ra>
